<compile_context>
chip_gen: v6e
topology: v6e:2x2x1
jax: 0.10.0
libtpu: 0.0.40
codegen_flags: <defaults>
</compile_context>

<pallas_src>
import jax
import jax.numpy as jnp
from jax.experimental import pallas as pl
from jax.experimental.pallas import tpu as pltpu

LANE = 512            # last-dim width: large multiple of 128 -> unmasked full-lane vector stores
TILE_ROWS = 1024      # 1024*512*4B = 2 MiB per f32 buffer; in+out double-buffered = 8 MiB (fits v5e)
ALIGN = LANE * 8      # 4096 elems: smallest (8, LANE)-aligned slab granule
SMALL_N = 1 << 18     # below ~256K elems a fused XLA scalar FMA beats pallas_call launch overhead


def fused_affine_kernel(params_ref, x_ref, o_ref):
    # params_ref lives in SMEM (f32): [a, c] with out = a*x + c
    a = params_ref[0]
    c = params_ref[1]
    x = x_ref[...].astype(jnp.float32)
    o_ref[...] = (x * a + c).astype(o_ref.dtype)


def _fold_params(w1, b1, w2, b2):
    w1f = jnp.asarray(w1, jnp.float32).reshape(())
    b1f = jnp.asarray(b1, jnp.float32).reshape(())
    w2f = jnp.asarray(w2, jnp.float32).reshape(())
    b2f = jnp.asarray(b2, jnp.float32).reshape(())
    a = 1.0 + w1f * (1.0 + w2f)
    c = b1f * (1.0 + w2f) + b2f
    return a, c


def _round_up(n, m):
    return ((n + m - 1) // m) * m


def _choose_tile_rows(rows):
    """rows is a multiple of 8. Keep each buffer <= 2 MiB and produce >= 2 grid blocks
    whenever the slab is larger than one 8-row group, so v7x megacore can shard the grid."""
    if rows <= 8:
        return rows
    if rows >= 2 * TILE_ROWS:
        return TILE_ROWS
    half = _round_up((rows + 1) // 2, 8)
    return min(half, TILE_ROWS)


def _pallas_affine_slab(x2d, params):
    rows, lane = x2d.shape
    tile_rows = _choose_tile_rows(rows)
    grid = (pl.cdiv(rows, tile_rows),)  # partial last block is masked; no padding needed
    return pl.pallas_call(
        fused_affine_kernel,
        out_shape=jax.ShapeDtypeStruct(x2d.shape, x2d.dtype),
        grid=grid,
        in_specs=[
            pl.BlockSpec(memory_space=pltpu.MemorySpace.SMEM),   # folded [a, c] scalars
            pl.BlockSpec((tile_rows, lane), lambda i: (i, 0)),   # lane-dense x tile
        ],
        out_specs=pl.BlockSpec((tile_rows, lane), lambda i: (i, 0)),
        compiler_params=pltpu.CompilerParams(
            dimension_semantics=("parallel",),                   # blocks shard across TensorCores
        ),
    )(params, x2d)


def model_forward(x, w1, b1, w2, b2, *, force_pallas=False):
    """Forward of the PyTorch module for x of shape (B, 1, 1)."""
    B, M, N = x.shape
    assert M == 1 and N == 1, "Linear(1,1) + permute pattern requires trailing dims of size 1"
    a, c = _fold_params(w1, b1, w2, b2)
    n = B * M * N

    if n < SMALL_N and not force_pallas:
        # Tiny inputs: one fused XLA elementwise pass is the true roofline; Pallas is pure overhead.
        return (x.astype(jnp.float32) * a + c).astype(x.dtype)

    params = jnp.stack([a, c])  # (2,) f32 -> SMEM
    x_flat = x.reshape(-1)
    n_main = (n // ALIGN) * ALIGN

    if n_main == n:
        # Fully aligned: pure-view reshapes, zero extra HBM traffic around the kernel.
        x2d = x_flat.reshape(n // LANE, LANE)
        return _pallas_affine_slab(x2d, params).reshape(B, M, N)

    # Ragged size: aligned prefix through Pallas, tiny tail (< ALIGN elems) in plain jnp.
    pieces = []
    if n_main > 0:
        x2d = x_flat[:n_main].reshape(n_main // LANE, LANE)
        pieces.append(_pallas_affine_slab(x2d, params).reshape(-1))
    tail = x_flat[n_main:]
    pieces.append((tail.astype(jnp.float32) * a + c).astype(x.dtype))
    out_flat = jnp.concatenate(pieces) if len(pieces) > 1 else pieces[0]
    return out_flat.reshape(B, M, N)


def reference_forward(x, w1, b1, w2, b2):
    # Pure-JAX transcription of the PyTorch forward (un-folded op order).
    v1 = x * w1 + b1
    v2 = jnp.transpose(v1, (0, 2, 1))
    v3 = v2 * w2 + b2
    v4 = jnp.transpose(v3, (0, 2, 1))
    return v1 + v4 + x


if __name__ == "__main__":
    key = jax.random.PRNGKey(0)
    kx1, kx2, kp = jax.random.split(key, 3)

    # Deterministic scalar parameters (Linear(1,1) weights/biases are scalars).
    pw = jax.random.normal(kp, (4,), dtype=jnp.float32)
    w1, b1, w2, b2 = pw[0], pw[1], pw[2], pw[3]

    # 1) Small shape consistent with the module (B,1,1): takes the fused-XLA dispatch path.
    x_small = jax.random.normal(kx1, (4, 1, 1), dtype=jnp.float32)
    out_small = jax.block_until_ready(model_forward(x_small, w1, b1, w2, b2))
    ref_small = reference_forward(x_small, w1, b1, w2, b2)
    assert out_small.shape == x_small.shape and out_small.dtype == x_small.dtype
    assert jnp.allclose(out_small, ref_small, atol=1e-5, rtol=1e-5)

    # 2) Larger batch forced through the Pallas path: 5*ALIGN aligned prefix (2-block parallel
    #    grid with a masked partial last block) + 1000-element ragged jnp tail.
    B = 5 * ALIGN + 1000
    x_big = jax.random.normal(kx2, (B, 1, 1), dtype=jnp.float32)
    out_big = jax.block_until_ready(model_forward(x_big, w1, b1, w2, b2, force_pallas=True))
    ref_big = reference_forward(x_big, w1, b1, w2, b2)
    assert out_big.shape == x_big.shape and out_big.dtype == x_big.dtype
    assert jnp.allclose(out_big, ref_big, atol=1e-5, rtol=1e-5)

    print("KERNEL_OK")
</pallas_src>

<mosaic_0001>
module attributes {stable_mosaic.version = 11 : i64} {
  func.func @fused_affine_kernel(%arg0: i32, %arg1: memref<2xf32, #tpu.memory_space<smem>>, %arg2: memref<24x512xf32, #tpu.memory_space<vmem>>, %arg3: memref<24x512xf32, #tpu.memory_space<vmem>>) attributes {dimension_semantics = [#tpu.dimension_semantics<parallel>], iteration_bounds = array<i64: 2>, scalar_prefetch = 0 : i64, scratch_operands = 0 : i64, tpu.core_type = #tpu.core_type<tc>, window_params = [{transform_indices = @transform_0, window_bounds = array<i64: 2>}, {transform_indices = @transform_1, window_bounds = array<i64: 24, 512>}, {transform_indices = @transform_2, window_bounds = array<i64: 24, 512>}]} {
    %c0 = arith.constant 0 : index
    %0 = memref.load %arg1[%c0] : memref<2xf32, #tpu.memory_space<smem>>
    %c1 = arith.constant 1 : index
    %1 = memref.load %arg1[%c1] : memref<2xf32, #tpu.memory_space<smem>>
    %c0_0 = arith.constant 0 : index
    %c0_1 = arith.constant 0 : index
    %2 = vector.load %arg2[%c0_0, %c0_1] : memref<24x512xf32, #tpu.memory_space<vmem>>, vector<24x512xf32>
    %3 = vector.broadcast %0 : f32 to vector<24x512xf32>
    %4 = arith.mulf %2, %3 : vector<24x512xf32>
    %5 = vector.broadcast %1 : f32 to vector<24x512xf32>
    %6 = arith.addf %4, %5 : vector<24x512xf32>
    %c0_2 = arith.constant 0 : index
    %c0_3 = arith.constant 0 : index
    %7 = vector.load %arg3[%c0_2, %c0_3] : memref<24x512xf32, #tpu.memory_space<vmem>>, vector<24x512xf32>
    tpu.vector_store %arg3[%c0_2, %c0_3], %6 {strides = array<i32>} : memref<24x512xf32, #tpu.memory_space<vmem>>, vector<24x512xf32>,
    return
  }
  func.func @transform_0(%arg0: i32) -> i32 {
    %c0_i32 = arith.constant 0 : i32
    %c0_i32_0 = arith.constant 0 : i32
    return %c0_i32 : i32
  }
  func.func @transform_1(%arg0: i32) -> (i32, i32) {
    %c0_i32 = arith.constant 0 : i32
    %c0_i32_0 = arith.constant 0 : i32
    return %arg0, %c0_i32 : i32, i32
  }
  func.func @transform_2(%arg0: i32) -> (i32, i32) {
    %c0_i32 = arith.constant 0 : i32
    %c0_i32_0 = arith.constant 0 : i32
    return %arg0, %c0_i32 : i32, i32
  }
}

</mosaic_0001>

<bundles_post_ra>
// kernel: tpu_custom_call.1
= control target key start
LH: loop header
LB: loop body
LE: loop exit
PB: predicated region body
PF: predicated region fallthrough
CT: control target
= control target key end

     0   :  { %7 = vsyncpa [#allocation5], 0  ;;  %s781_s0 = inlined_call_operand.hbm [shape: f32[2], index: 0, kind: input, shape index: {}]   ;;  %s782_s1 = inlined_call_operand.hbm [shape: f32[40,512], index: 1, kind: input, shape index: {}]   ;;  %s783_s2 = inlined_call_operand.hbm [shape: f32[40,512], index: 2, kind: output, shape index: {}]  }
   0x1   :  { %8 = vsyncpa [#allocation3], 0 }
   0x2   :  { %10 = vsyncpa [#allocation3 + $0x1], 0 }
   0x3   :  { %11 = vsyncpa [#allocation4], 0 }
   0x4   :  { %13 = vsyncpa [#allocation4 + $0x1], 0  ;;  %s569_s9 = smov 0   ;;  %s571_s10 = smov 0  }
   0x5   :  { %s573_s11 = smov 0   ;;  %s575_s12 = smov 0  }
   0x6 LB: > { %s590_s13 = sadd.s32 4294967295, %s545_s12   ;;  %s353_s14 = sadd.s32 4294967294, %s545_s12   ;;  %s545_s12 = sphi %s575_s12, %s799_s12   ;;  %s541_s11 = sphi %s573_s11, %s798_s11   ;;  %s537_s10 = sphi %s571_s10, %s797_s10   ;;  %s533_s9 = sphi %s569_s9, %s796_s9  }
   0x7   : > { %s594_s15 = sadd.s32 1, %s545_s12   ;;  %s47_s16 = sadd.s32 1, %s541_s11 }
   0x8   : > { %s44_s17 = ssub.s32 %s545_s12, %s594_s15  ;;  %p54_p0 = scmp.ne.s32.totalorder %s541_s11, %s537_s10 }
   0x9   : > { %p45_p1 = scmp.eq.s32.totalorder %s44_s17, 0  ;;  %p55_p2 = scmp.eq.s32.totalorder %s545_s12, 0 }
   0xa   : > { %p60_p3 = scmp.ne.s32.totalorder %s537_s10, %s533_s9  ;;  %p785_p4 = scmp.eq.s32.totalorder %s590_s13, 0 }
   0xb   : > { %s606_s18 = scalar_select %p45_p1, %s541_s11, %s47_s16  }
   0xc   : > { %p608_p5 = por %p55_p2, %p54_p0  ;;  %p614_p6 = por %p785_p4, %p60_p3 }
   0xd   : > { %p84_p7 = scmp.eq.s32.totalorder %s590_s13, 1  ;;  %p90_p8 = scmp.eq.s32.totalorder %s353_s14, 1 }
   0xe   : > { %p354_p9 = scmp.ge.s32.totalorder %s545_s12, 1  ;;  %p97_p10 = scmp.lt.s32.totalorder %s545_s12, 3 }
   0xf   : > { %p621_p11 = por %p84_p7, %p54_p0  ;;  %p625_p12 = por %p90_p8, %p60_p3 }
  0x10   : > { %p629_p13 = pnand %p354_p9, %p97_p10  ;;  %s547_s24 = smov [#allocation2]  }
  0x11   : > { %s788_s21 = scalar_select %p621_p11, 1, 0 }
  0x12   : > { %s789_s22 = scalar_select %p625_p12, 1, 0 }
  0x13   : > { %p392_p1 = pneg %p629_p13  ;;  %p784_p0 = scmp.ge.s32.totalorder %s545_s12, 2 }
  0x15   : > { %p393_p2 = pnand %p392_p1, %p785_p4  ;;  %115 = sbr.rel (%p784_p0) target bundleno = 60 (0x3c), region = 20 }
  0x17   : > { %395 = dma.hbm_to_smem (!%p393_p2), %s781_s0, 16, %s547_s24, [#allocation5]  }
  0x1a   : > { %118 = sbr.rel (!%p608_p5) target bundleno = 60 (0x3c), region = 24  ;;  %s119_s27 = sand.u32 (%p608_p5), 1, %s541_s11  }
  0x1b   : > { %s124_s28 = smul.u32 (%p608_p5), 3, %s545_s12  ;;  %s650_s5 = scalar_lea.sflag (%p608_p5), [#allocation3], %s119_s27 }
  0x1c   : > { %s384_s29 = smul.u32 (%p608_p5), 96, %s119_s27 }
  0x1d   : > { %s125_s30 = ssub.s32 (%p608_p5), 5, %s124_s28 }
  0x1e   : > { %p126_p3 = scmp.lt.s32.totalorder (%p608_p5), %s125_s30, 3  ;;  %s123_s6 = scalar_lea.vmem (%p608_p5), [#allocation6], %s384_s29 }
  0x20   : > { %s801_s30 = smov (!%p126_p3, %s125_s30), 3 }
  0x21   : > { %s647_s3 = sshll.u32 %s801_s30, 9 }
  0x22   : > { %s131_s4 = ssub.s32 1536, %s647_s3 }
  0x23   : > { %132 = vsyncadd %s650_s5, %s131_s4  ;;  %p359_p5 = scmp.ne.s32.totalorder %s647_s3, 0  ;;  %s382_s7 = smul.u32 1536, %s545_s12 }
  0x24   : > { %s138_s8 = sshll.u32 %s123_s6, 4  ;;  %s455_s26 = scalar_lea.hbm %s782_s1, 2560  ;;  %s660_s8 = int_to_ptr.vmem [resolvable:$true] %s138_s8 }
  0x25   : > { %s658_s17 = scalar_lea.hbm %s782_s1, %s382_s7 }
  0x26   : > { %s451_s19 = scalar_lea.hbm %s658_s17, %s647_s3  ;;  %p456_p10 = scmp.lt.s32.totalorder %s658_s17, %s782_s1 }
  0x27   : > { %p452_p7 = scmp.ne.s32.totalorder %s658_s17, %s451_s19  ;;  %p457_p1 = scmp.lt.s32.totalorder %s455_s26, %s451_s19 }
  0x29   : > { %p453_p8 = pnand %p452_p7, %p359_p5  ;;  %p458_p2 = por %p457_p1, %p456_p10 }
  0x2b   : > { %p454_p9 = pneg %p453_p8 }
  0x2d   : > { %p459_p3 = pnand %p458_p2, %p454_p9 }
  0x2f   : > { %462 = shalt.err (!%p459_p3)
}
  0x30   : > { %s463_s29 = scalar_lea.vmem %s660_s8, %s647_s3  ;;  %s548_s30 = smov [#allocation6]  }
  0x31   : > { %p464_p7 = scmp.ne.s32.totalorder %s660_s8, %s463_s29  ;;  %s467_s4 = sshll.u32 %s548_s30, 4  ;;  %s468_s4 = int_to_ptr.vmem [resolvable:$false] %s467_s4 }
  0x32   : > { %s469_s6 = scalar_lea.vmem %s468_s4, 3072  ;;  %p470_p4 = scmp.lt.s32.totalorder %s660_s8, %s468_s4 }
  0x33   : > { %p465_p8 = pnand %p464_p7, %p359_p5  ;;  %p471_p12 = scmp.lt.s32.totalorder %s469_s6, %s463_s29 }
  0x35   : > { %p466_p0 = pneg %p465_p8  ;;  %p472_p11 = por %p471_p12, %p470_p4 }
  0x37   : > { %p473_p10 = pnand %p472_p11, %p466_p0 }
  0x39   : > { %476 = shalt.err (!%p473_p10)
}
  0x3a   : > { %s549_s7 = smov 512   ;;  %s550_s14 = smov 32  }
  0x3b   : > { %144 = dma.hbm_to_vmem [thread:$0]  (%p359_p5), %s658_s17, %s647_s3, %s660_s8, %s650_s5, %s549_s7, %s549_s7, %s550_s14  }
  0x3c PF: > { %150 = sbr.rel (%p629_p13) target bundleno = 117 (0x75), region = 28  ;;  %p791_p9 = scmp.eq.s32.totalorder (!%p629_p13), %s590_s13, 0 }
  0x41   : > { %520 = dma.done.wait (%p791_p9), [#allocation5], 16   ;;  %p792_p4 = pmov %p791_p9 }
  0x42   : > { %s693_s16 = sand.u32 1, %s537_s10  }
  0x43   : > { %522 = vsyncadd (%p792_p4), [#allocation5], 4294967280  ;;  %s385_s19 = smul.u32 96, %s693_s16  ;;  %s157_s3 = scalar_lea.sflag [#allocation3], %s693_s16 }
  0x45   : > { %s160_s5 = scalar_lea.vmem [#allocation6], %s385_s19 }
  0x46   : > { %524 = dma.done.wait (%p614_p6), %s157_s3, 1536  }
  0x47   : > { %526 = vsyncadd (%p614_p6), %s157_s3, 4294965760 }
  0x48   : > { %165 = sfence }
  0x49   : > { %s194_s23 = sld [smem:[#allocation2]]  ;;  %v196_v0 = vld [vmem:[%s160_s5] sm:$0xff]  ;;  %v197_v1 = vld [vmem:[%s160_s5 + $0x8] sm:$0xff]  ;;  %v198_v2 = vld [vmem:[%s160_s5 + $0x10] sm:$0xff]  ;;  %s705_s20 = scalar_lea.vmem [#allocation7], %s385_s19 }
  0x4a   : > { %s366_s8 = sld [smem:[#allocation2 + $0x1]]  ;;  %v199_v3 = vld [vmem:[%s160_s5 + $0x18] sm:$0xff]  ;;  %v200_v4 = vld [vmem:[%s160_s5 + $0x20] sm:$0xff]  ;;  %v201_v5 = vld [vmem:[%s160_s5 + $0x28] sm:$0xff]  ;;  %s247_s17 = scalar_lea.sflag [#allocation4], %s693_s16 }
  0x4b   : > { %v202_v6 = vld [vmem:[%s160_s5 + $0x30] sm:$0xff]  ;;  %v203_v8 = vld [vmem:[%s160_s5 + $0x38] sm:$0xff]  ;;  %v204_v17 = vld [vmem:[%s160_s5 + $0x40] sm:$0xff]  ;;  %p793_p6 = scmp.ne.s32.totalorder %s788_s21, 0 }
  0x4c   : > { %v205_v18 = vld [vmem:[%s160_s5 + $0x48] sm:$0xff]  ;;  %v206_v19 = vld [vmem:[%s160_s5 + $0x50] sm:$0xff]  ;;  %v207_v24 = vld [vmem:[%s160_s5 + $0x58] sm:$0xff]  ;;  %s254_s24 = smul.u32 (%p793_p6), 3, %s590_s13 }
  0x4e   : > { %s255_s25 = ssub.s32 (%p793_p6), 5, %s254_s24 }
  0x4f   : > { %v208_v7 = vstv %s194_s23  ;;  %p256_p11 = scmp.lt.s32.totalorder (%p793_p6), %s255_s25, 3 }
  0x50   : > { %v209_v9 = vmul.f32 %v208_v7, %v196_v0  ;;  %v221_v10 = vstv %s366_s8  ;;  %v210_v11 = vmul.f32 %v208_v7, %v197_v1  ;;  %v211_v12 = vmul.f32 %v208_v7, %v198_v2 }
  0x51   : > { %v212_v13 = vmul.f32 %v208_v7, %v199_v3  ;;  %v213_v14 = vmul.f32 %v208_v7, %v200_v4  ;;  %v214_v15 = vmul.f32 %v208_v7, %v201_v5  ;;  %v215_v16 = vmul.f32 %v208_v7, %v202_v6 }
  0x52   : > { %v222_v20 = vadd.f32 %v221_v10, %v209_v9  ;;  %v223_v21 = vadd.f32 %v221_v10, %v210_v11  ;;  %v224_v22 = vadd.f32 %v221_v10, %v211_v12  ;;  %v216_v23 = vmul.f32 %v208_v7, %v203_v8 }
  0x53   : > { %v225_v25 = vadd.f32 %v221_v10, %v212_v13  ;;  %v226_v26 = vadd.f32 %v221_v10, %v213_v14  ;;  %v227_v27 = vadd.f32 %v221_v10, %v214_v15  ;;  %v228_v28 = vadd.f32 %v221_v10, %v215_v16 }
  0x54   : > { %234 = vst [vmem:[%s705_s20] sm:$0xff] %v222_v20  ;;  %235 = vst [vmem:[%s705_s20 + $0x8] sm:$0xff] %v223_v21  ;;  %v229_v29 = vadd.f32 %v221_v10, %v216_v23  ;;  %v217_v30 = vmul.f32 %v208_v7, %v204_v17  ;;  %v218_v31 = vmul.f32 %v208_v7, %v205_v18 }
  0x55   : > { %236 = vst [vmem:[%s705_s20 + $0x10] sm:$0xff] %v224_v22  ;;  %v219_v32 = vmul.f32 %v208_v7, %v206_v19  ;;  %237 = vst [vmem:[%s705_s20 + $0x18] sm:$0xff] %v225_v25  ;;  %v220_v33 = vmul.f32 %v208_v7, %v207_v24  ;;  %253 = sbr.rel (!%p793_p6) target bundleno = 117 (0x75), region = 40 }
  0x56   : > { %238 = vst [vmem:[%s705_s20 + $0x20] sm:$0xff] %v226_v26  ;;  %239 = vst [vmem:[%s705_s20 + $0x28] sm:$0xff] %v227_v27  ;;  %v230_v34 = vadd.f32 %v221_v10, %v217_v30  ;;  %v231_v35 = vadd.f32 %v221_v10, %v218_v31 }
  0x57   : > { %240 = vst [vmem:[%s705_s20 + $0x30] sm:$0xff] %v228_v28  ;;  %241 = vst [vmem:[%s705_s20 + $0x38] sm:$0xff] %v229_v29  ;;  %v232_v36 = vadd.f32 %v221_v10, %v219_v32  ;;  %v233_v37 = vadd.f32 %v221_v10, %v220_v33 }
  0x58   : > { %242 = vst [vmem:[%s705_s20 + $0x40] sm:$0xff] %v230_v34  ;;  %243 = vst [vmem:[%s705_s20 + $0x48] sm:$0xff] %v231_v35 }
  0x59   : > { %244 = vst [vmem:[%s705_s20 + $0x50] sm:$0xff] %v232_v36  ;;  %245 = vst [vmem:[%s705_s20 + $0x58] sm:$0xff] %v233_v37 }
  0x5a   : > { %s803_s25 = smov (!%p256_p11, %s255_s25), 3 }
  0x5b   : > { %s723_s26 = sshll.u32 %s803_s25, 9 }
  0x5c   : > { %s261_s27 = ssub.s32 1536, %s723_s26 }
  0x5d   : > { %262 = vsyncadd %s247_s17, %s261_s27  ;;  %p369_p12 = scmp.ne.s32.totalorder %s723_s26, 0  ;;  %s383_s21 = smul.u32 1536, %s590_s13 }
  0x5e   : > { %s268_s28 = sshll.u32 %s705_s20, 4  ;;  %s551_s7 = smov [#allocation7]   ;;  %s736_s28 = int_to_ptr.vmem [resolvable:$true] %s268_s28 }
  0x5f   : > { %s734_s4 = scalar_lea.hbm %s783_s2, %s383_s21  ;;  %s477_s6 = scalar_lea.vmem %s736_s28, %s723_s26 }
  0x60   : > { %p478_p13 = scmp.ne.s32.totalorder %s736_s28, %s477_s6  ;;  %s481_s14 = sshll.u32 %s551_s7, 4  ;;  %s482_s14 = int_to_ptr.vmem [resolvable:$false] %s481_s14 }
  0x61   : > { %s483_s13 = scalar_lea.vmem %s482_s14, 3072  ;;  %p484_p1 = scmp.lt.s32.totalorder %s736_s28, %s482_s14 }
  0x62   : > { %p479_p0 = pnand %p478_p13, %p369_p12  ;;  %p485_p2 = scmp.lt.s32.totalorder %s483_s13, %s477_s6 }
  0x64   : > { %p480_p5 = pneg %p479_p0  ;;  %p486_p3 = por %p485_p2, %p484_p1 }
  0x66   : > { %p487_p7 = pnand %p486_p3, %p480_p5 }
  0x68   : > { %490 = shalt.err (!%p487_p7)
}
  0x69   : > { %s491_s19 = scalar_lea.hbm %s734_s4, %s723_s26  ;;  %s495_s23 = scalar_lea.hbm %s783_s2, 2560 }
  0x6a   : > { %p492_p8 = scmp.ne.s32.totalorder %s734_s4, %s491_s19  ;;  %p496_p4 = scmp.lt.s32.totalorder %s734_s4, %s783_s2 }
  0x6b   : > { %p497_p6 = scmp.lt.s32.totalorder %s495_s23, %s491_s19 }
  0x6c   : > { %p493_p10 = pnand %p492_p8, %p369_p12 }
  0x6d   : > { %p498_p11 = por %p497_p6, %p496_p4 }
  0x6e   : > { %p494_p9 = pneg %p493_p10 }
  0x70   : > { %p499_p13 = pnand %p498_p11, %p494_p9 }
  0x72   : > { %502 = shalt.err (!%p499_p13)
}
  0x73   : > { %s552_s24 = smov 512   ;;  %s553_s25 = smov 32  }
  0x74   : > { %274 = dma.vmem_to_hbm [thread:$0]  (%p369_p12), %s736_s28, %s723_s26, %s734_s4, %s247_s17, %s552_s24, %s552_s24, %s553_s25  }
  0x75 PF: > { %s283_s27 = sand.u32 1, %s533_s9   ;;  %p794_p0 = scmp.ne.s32.totalorder %s789_s22, 0 }
  0x76   : > { %p795_p5 = scmp.ge.s32.totalorder %s545_s12, 2  ;;  %s284_s21 = scalar_lea.sflag [#allocation4], %s283_s27 }
  0x78   : > { %p397_p1 = pnand %p795_p5, %p794_p0 }
  0x7a   : > { %p398_p2 = pneg %p397_p1 }
  0x7c   : > { %528 = dma.done.wait (%p398_p2), %s284_s21, 1536  }
  0x7d   : > { %530 = vsyncadd (%p398_p2), %s284_s21, 4294965760  ;;  %p16_p3 = scmp.ge.s32.totalorder %s594_s15, 4   ;;  %s796_s9 = smov %s537_s10 }
  0x7e   : > { %s797_s10 = smov %s541_s11  ;;  %s798_s11 = smov %s606_s18 }
  0x7f   : > { %s799_s12 = smov %s594_s15  ;;  %18 = sbr.rel (!%p16_p3) target bundleno = 6 (0x6), region = 78 }
  0x84   :  { %289 = vsyncpa [#allocation3], 1 }
  0x85   :  { %291 = vsyncpa [#allocation3 + $0x1], 1 }
  0x86   :  { %292 = vsyncpa [#allocation4], 1 }
  0x87   :  { %294 = vsyncpa [#allocation4 + $0x1], 1 }
  0x88   :  { %295 = vsyncpa [#allocation5], 1 }
  0x89   :  { %297 = vsyncpa [#allocation5 + $0x1], 1 }

</bundles_post_ra>
